<compile_context>
chip_gen: v6e
topology: v6e:2x2x1
jax: 0.10.0
libtpu: 0.0.40
codegen_flags: <defaults>
</compile_context>

<pallas_src>
import functools

import jax
import jax.numpy as jnp
from jax.experimental import pallas as pl
from jax.experimental.pallas import tpu as pltpu

_LANE = 128


def _round_up(n, m):
    return ((n + m - 1) // m) * m


def _sublanes(dtype):
    # Native sublane count per vreg tile: 8 for 4-byte, 16 for 2-byte, 32 for 1-byte.
    return max(8, 32 // jnp.dtype(dtype).itemsize)


def _block_budget():
    """(block_bytes_per_step, vmem_limit_bytes) chosen per TPU generation."""
    try:
        vmem_cap = pltpu.get_tpu_info().vmem_capacity_bytes
    except Exception:
        # Unknown part: conservative defaults.
        return 2 << 20, 32 << 20
    if vmem_cap >= (96 << 20):
        # v5e / v6e: 128 MiB physical VMEM -> big blocks, raise scoped limit
        # explicitly (v5e default scoped limit is only 16 MiB).
        return 4 << 20, 64 << 20
    # v7x: 64 MiB physical VMEM per TensorCore.
    return 4 << 20, 40 << 20


def _pick_tile_rows(rows, sub, bytes_per_row, block_bytes):
    """Rows per block and grid length for a 1-D row-tiled grid."""
    tm = max(sub, (block_bytes // max(bytes_per_row, 1)) // sub * sub)
    # Keep at least ~4 grid steps when there is enough work: shards the
    # "parallel" axis across both TensorCores on megacore parts and gives the
    # software pipeline something to overlap.
    if rows >= 4 * sub:
        tm = min(tm, _round_up(pl.cdiv(rows, 4), sub))
    if tm >= rows:
        return rows, 1          # single full-extent block
    return tm, pl.cdiv(rows, tm)  # partial last block is fine (row-independent op)


# ----------------------------------------------------------------------------
# Kernels
# ----------------------------------------------------------------------------

def _rsoftmax_rows_kernel(x_ref, o_ref, *, radix, rch):
    """Softmax across `radix` lane-aligned chunks of a (tm, radix*rch) block.

    rch % 128 == 0, so every chunk slice is a full-width, lane-aligned slab:
    pure VPU/EUP work, unmasked stores, no XLU. 3-pass structure keeps only the
    running max and the exp-sum live (exp goes straight to o_ref, rescaled in
    place).
    """
    m = x_ref[:, 0:rch].astype(jnp.float32)
    for r in range(1, radix):
        m = jnp.maximum(m, x_ref[:, r * rch:(r + 1) * rch].astype(jnp.float32))
    s = None
    for r in range(radix):
        e = jnp.exp(x_ref[:, r * rch:(r + 1) * rch].astype(jnp.float32) - m)
        o_ref[:, r * rch:(r + 1) * rch] = e.astype(o_ref.dtype)
        s = e if s is None else s + e
    inv = pl.reciprocal(s)  # exact; approx=True would strain the 1e-5 tolerance
    for r in range(radix):
        o_ref[:, r * rch:(r + 1) * rch] = (
            o_ref[:, r * rch:(r + 1) * rch].astype(jnp.float32) * inv
        ).astype(o_ref.dtype)


def _rsoftmax_radix_major_kernel(x_ref, o_ref):
    """Softmax over the leading (radix) axis of a (radix, tm, 128) block."""
    radix = x_ref.shape[0]
    m = x_ref[0].astype(jnp.float32)
    for r in range(1, radix):
        m = jnp.maximum(m, x_ref[r].astype(jnp.float32))
    s = None
    for r in range(radix):
        e = jnp.exp(x_ref[r].astype(jnp.float32) - m)
        o_ref[r] = e.astype(o_ref.dtype)
        s = e if s is None else s + e
    inv = pl.reciprocal(s)
    for r in range(radix):
        o_ref[r] = (o_ref[r].astype(jnp.float32) * inv).astype(o_ref.dtype)


def _sigmoid_kernel(x_ref, o_ref):
    # lax.logistic rides the EUP slot instead of a VPU Newton divide sequence.
    o_ref[...] = jax.nn.sigmoid(x_ref[...].astype(jnp.float32)).astype(o_ref.dtype)


# ----------------------------------------------------------------------------
# Wrapper (forward pass of rSoftMax)
# ----------------------------------------------------------------------------

def rsoftmax(x, radix, groups):
    """Pallas implementation of rSoftMax.forward.

    radix > 1: softmax over the radix axis of the (B, groups, radix, -1) view,
               flattened back to (B, C, 1, 1).
    radix == 1: elementwise sigmoid (shape preserved).
    """
    B = x.shape[0]
    feat = 1
    for d in x.shape[1:]:
        feat *= d
    dtype = x.dtype
    itemsize = jnp.dtype(dtype).itemsize
    sub = _sublanes(dtype)
    block_bytes, vmem_limit = _block_budget()

    if radix > 1:
        assert feat % (groups * radix) == 0
        rch = feat // (groups * radix)

        if rch % _LANE == 0:
            # ---- Natural-layout fast path: zero transpose / zero pad. ----
            R = B * groups
            cols = radix * rch
            x2 = x.reshape(R, cols)  # free metadata reshape
            tm, grid = _pick_tile_rows(R, sub, cols * itemsize, block_bytes)
            kernel = functools.partial(_rsoftmax_rows_kernel, radix=radix, rch=rch)
            out = pl.pallas_call(
                kernel,
                out_shape=jax.ShapeDtypeStruct((R, cols), dtype),
                grid=(grid,),
                in_specs=[pl.BlockSpec((tm, cols), lambda i: (i, 0))],
                out_specs=pl.BlockSpec((tm, cols), lambda i: (i, 0)),
                compiler_params=pltpu.CompilerParams(
                    dimension_semantics=("parallel",),
                    vmem_limit_bytes=vmem_limit),
                cost_estimate=pl.CostEstimate(
                    flops=5 * R * cols,
                    transcendentals=(radix + 1) * R * rch,
                    bytes_accessed=2 * R * cols * itemsize),
            )(x2)
            return out.reshape(B, feat, 1, 1)

        # ---- Fallback for small / lane-unaligned rch: radix-major slabs. ----
        P = B * groups * rch
        xt = jnp.transpose(x.reshape(B, groups, radix, rch), (2, 0, 1, 3))
        xt = xt.reshape(radix, P)
        P_pad = _round_up(P, _LANE)          # pad only to a lane multiple
        if P_pad != P:
            xt = jnp.pad(xt, ((0, 0), (0, P_pad - P)))
        M = P_pad // _LANE
        x3 = xt.reshape(radix, M, _LANE)
        tm, grid = _pick_tile_rows(M, sub, radix * _LANE * itemsize, block_bytes)
        out = pl.pallas_call(
            _rsoftmax_radix_major_kernel,
            out_shape=jax.ShapeDtypeStruct((radix, M, _LANE), dtype),
            grid=(grid,),
            in_specs=[pl.BlockSpec((radix, tm, _LANE), lambda i: (0, i, 0))],
            out_specs=pl.BlockSpec((radix, tm, _LANE), lambda i: (0, i, 0)),
            compiler_params=pltpu.CompilerParams(
                dimension_semantics=("parallel",),
                vmem_limit_bytes=vmem_limit,
                allow_input_fusion=[True]),  # fuse the producing transpose
            cost_estimate=pl.CostEstimate(
                flops=5 * radix * P_pad,
                transcendentals=(radix + 1) * P_pad,
                bytes_accessed=2 * radix * P_pad * itemsize),
        )(x3)
        out = out.reshape(radix, P_pad)[:, :P].reshape(radix, B, groups, rch)
        # Inverse of (2,0,1,3): back to (B, groups, radix, rch), flatten in
        # (groups, radix, rch) order to match torch's view.
        return jnp.transpose(out, (1, 2, 0, 3)).reshape(B, feat, 1, 1)

    # ---- radix == 1: elementwise sigmoid, shape preserved. ----
    N = B * feat
    xf = x.reshape(-1)
    N_pad = _round_up(N, _LANE)
    if N_pad != N:
        xf = jnp.pad(xf, (0, N_pad - N))
    rows = N_pad // _LANE
    x2 = xf.reshape(rows, _LANE)
    tm, grid = _pick_tile_rows(rows, sub, _LANE * itemsize, block_bytes)
    out = pl.pallas_call(
        _sigmoid_kernel,
        out_shape=jax.ShapeDtypeStruct((rows, _LANE), dtype),
        grid=(grid,),
        in_specs=[pl.BlockSpec((tm, _LANE), lambda i: (i, 0))],
        out_specs=pl.BlockSpec((tm, _LANE), lambda i: (i, 0)),
        compiler_params=pltpu.CompilerParams(
            dimension_semantics=("parallel",),
            vmem_limit_bytes=vmem_limit),
        cost_estimate=pl.CostEstimate(
            flops=3 * N,
            transcendentals=N,
            bytes_accessed=2 * N * itemsize),
    )(x2)
    return out.reshape(N_pad)[:N].reshape(x.shape)


if __name__ == "__main__":
    k0, k1 = jax.random.split(jax.random.PRNGKey(0))

    # 1) radix > 1 with small / lane-unaligned rch -> radix-major fallback path.
    B, groups, radix, rch = 2, 4, 2, 8
    C = groups * radix * rch  # 64
    x = jax.random.normal(k0, (B, C, 1, 1), dtype=jnp.float32)
    y = jax.block_until_ready(rsoftmax(x, radix=radix, groups=groups))
    ref = jax.nn.softmax(x.reshape(B, groups, radix, rch), axis=2).reshape(B, C, 1, 1)
    assert y.shape == (B, C, 1, 1)
    assert jnp.allclose(y, ref, atol=1e-5, rtol=1e-5)

    # 2) radix > 1 with lane-aligned rch (rch % 128 == 0) -> natural-layout path.
    B2, g2, r2, rc2 = 2, 2, 2, 128
    C2 = g2 * r2 * rc2  # 512
    x2 = jax.random.normal(k1, (B2, C2, 1, 1), dtype=jnp.float32)
    y2 = jax.block_until_ready(rsoftmax(x2, radix=r2, groups=g2))
    ref2 = jax.nn.softmax(x2.reshape(B2, g2, r2, rc2), axis=2).reshape(B2, C2, 1, 1)
    assert y2.shape == (B2, C2, 1, 1)
    assert jnp.allclose(y2, ref2, atol=1e-5, rtol=1e-5)

    # 3) radix == 1 -> elementwise sigmoid.
    y1 = jax.block_until_ready(rsoftmax(x, radix=1, groups=groups))
    ref1 = jax.nn.sigmoid(x)
    assert jnp.allclose(y1, ref1, atol=1e-5, rtol=1e-5)

    print("KERNEL_OK")
</pallas_src>

<mosaic_0001>
module attributes {stable_mosaic.version = 11 : i64} {
  func.func @_rsoftmax_radix_major_kernel(%arg0: i32, %arg1: memref<2x1x128xf32, #tpu.memory_space<vmem>>, %arg2: memref<2x1x128xf32, #tpu.memory_space<vmem>>) attributes {dimension_semantics = [#tpu.dimension_semantics<parallel>], iteration_bounds = array<i64: 1>, scalar_prefetch = 0 : i64, scratch_operands = 0 : i64, tpu.core_type = #tpu.core_type<tc>, window_params = [{transform_indices = @transform_0, window_bounds = array<i64: 2, 1, 128>}, {transform_indices = @transform_1, window_bounds = array<i64: 2, 1, 128>}]} {
    %c0 = arith.constant 0 : index
    %c0_0 = arith.constant 0 : index
    %c0_1 = arith.constant 0 : index
    %0 = vector.load %arg1[%c0, %c0_0, %c0_1] : memref<2x1x128xf32, #tpu.memory_space<vmem>>, vector<1x1x128xf32>
    %1 = vector.shape_cast %0 : vector<1x1x128xf32> to vector<1x128xf32>
    %c1 = arith.constant 1 : index
    %c0_2 = arith.constant 0 : index
    %c0_3 = arith.constant 0 : index
    %2 = vector.load %arg1[%c1, %c0_2, %c0_3] : memref<2x1x128xf32, #tpu.memory_space<vmem>>, vector<1x1x128xf32>
    %3 = vector.shape_cast %2 : vector<1x1x128xf32> to vector<1x128xf32>
    %4 = arith.maximumf %1, %3 : vector<1x128xf32>
    %c0_4 = arith.constant 0 : index
    %c0_5 = arith.constant 0 : index
    %c0_6 = arith.constant 0 : index
    %5 = vector.load %arg1[%c0_4, %c0_5, %c0_6] : memref<2x1x128xf32, #tpu.memory_space<vmem>>, vector<1x1x128xf32>
    %6 = vector.shape_cast %5 : vector<1x1x128xf32> to vector<1x128xf32>
    %7 = arith.subf %6, %4 : vector<1x128xf32>
    %8 = math.exp %7 : vector<1x128xf32>
    %c0_7 = arith.constant 0 : index
    %c0_8 = arith.constant 0 : index
    %c0_9 = arith.constant 0 : index
    %9 = vector.load %arg2[%c0_7, %c0_8, %c0_9] : memref<2x1x128xf32, #tpu.memory_space<vmem>>, vector<1x1x128xf32>
    %10 = vector.shape_cast %9 : vector<1x1x128xf32> to vector<1x128xf32>
    %11 = vector.shape_cast %8 : vector<1x128xf32> to vector<1x1x128xf32>
    tpu.vector_store %arg2[%c0_7, %c0_8, %c0_9], %11 {strides = array<i32>} : memref<2x1x128xf32, #tpu.memory_space<vmem>>, vector<1x1x128xf32>,
    %c1_10 = arith.constant 1 : index
    %c0_11 = arith.constant 0 : index
    %c0_12 = arith.constant 0 : index
    %12 = vector.load %arg1[%c1_10, %c0_11, %c0_12] : memref<2x1x128xf32, #tpu.memory_space<vmem>>, vector<1x1x128xf32>
    %13 = vector.shape_cast %12 : vector<1x1x128xf32> to vector<1x128xf32>
    %14 = arith.subf %13, %4 : vector<1x128xf32>
    %15 = math.exp %14 : vector<1x128xf32>
    %c1_13 = arith.constant 1 : index
    %c0_14 = arith.constant 0 : index
    %c0_15 = arith.constant 0 : index
    %16 = vector.load %arg2[%c1_13, %c0_14, %c0_15] : memref<2x1x128xf32, #tpu.memory_space<vmem>>, vector<1x1x128xf32>
    %17 = vector.shape_cast %16 : vector<1x1x128xf32> to vector<1x128xf32>
    %18 = vector.shape_cast %15 : vector<1x128xf32> to vector<1x1x128xf32>
    tpu.vector_store %arg2[%c1_13, %c0_14, %c0_15], %18 {strides = array<i32>} : memref<2x1x128xf32, #tpu.memory_space<vmem>>, vector<1x1x128xf32>,
    %19 = arith.addf %8, %15 : vector<1x128xf32>
    %20 = tpu.reciprocal %19 : vector<1x128xf32> -> vector<1x128xf32>
    %c0_16 = arith.constant 0 : index
    %c0_17 = arith.constant 0 : index
    %c0_18 = arith.constant 0 : index
    %21 = vector.load %arg2[%c0_16, %c0_17, %c0_18] : memref<2x1x128xf32, #tpu.memory_space<vmem>>, vector<1x1x128xf32>
    %22 = vector.shape_cast %21 : vector<1x1x128xf32> to vector<1x128xf32>
    %23 = arith.mulf %22, %20 : vector<1x128xf32>
    %c0_19 = arith.constant 0 : index
    %c0_20 = arith.constant 0 : index
    %c0_21 = arith.constant 0 : index
    %24 = vector.load %arg2[%c0_19, %c0_20, %c0_21] : memref<2x1x128xf32, #tpu.memory_space<vmem>>, vector<1x1x128xf32>
    %25 = vector.shape_cast %24 : vector<1x1x128xf32> to vector<1x128xf32>
    %26 = vector.shape_cast %23 : vector<1x128xf32> to vector<1x1x128xf32>
    tpu.vector_store %arg2[%c0_19, %c0_20, %c0_21], %26 {strides = array<i32>} : memref<2x1x128xf32, #tpu.memory_space<vmem>>, vector<1x1x128xf32>,
    %c1_22 = arith.constant 1 : index
    %c0_23 = arith.constant 0 : index
    %c0_24 = arith.constant 0 : index
    %27 = vector.load %arg2[%c1_22, %c0_23, %c0_24] : memref<2x1x128xf32, #tpu.memory_space<vmem>>, vector<1x1x128xf32>
    %28 = vector.shape_cast %27 : vector<1x1x128xf32> to vector<1x128xf32>
    %29 = arith.mulf %28, %20 : vector<1x128xf32>
    %c1_25 = arith.constant 1 : index
    %c0_26 = arith.constant 0 : index
    %c0_27 = arith.constant 0 : index
    %30 = vector.load %arg2[%c1_25, %c0_26, %c0_27] : memref<2x1x128xf32, #tpu.memory_space<vmem>>, vector<1x1x128xf32>
    %31 = vector.shape_cast %30 : vector<1x1x128xf32> to vector<1x128xf32>
    %32 = vector.shape_cast %29 : vector<1x128xf32> to vector<1x1x128xf32>
    tpu.vector_store %arg2[%c1_25, %c0_26, %c0_27], %32 {strides = array<i32>} : memref<2x1x128xf32, #tpu.memory_space<vmem>>, vector<1x1x128xf32>,
    return
  }
  func.func @transform_0(%arg0: i32) -> (i32, i32, i32) {
    %c0_i32 = arith.constant 0 : i32
    %c0_i32_0 = arith.constant 0 : i32
    %c0_i32_1 = arith.constant 0 : i32
    return %c0_i32, %arg0, %c0_i32_0 : i32, i32, i32
  }
  func.func @transform_1(%arg0: i32) -> (i32, i32, i32) {
    %c0_i32 = arith.constant 0 : i32
    %c0_i32_0 = arith.constant 0 : i32
    %c0_i32_1 = arith.constant 0 : i32
    return %c0_i32, %arg0, %c0_i32_0 : i32, i32, i32
  }
}

</mosaic_0001>

<bundles_post_ra>
// kernel: tpu_custom_call.1
= control target key start
LH: loop header
LB: loop body
LE: loop exit
PB: predicated region body
PF: predicated region fallthrough
CT: control target
= control target key end

     0   :  { %6 = vsyncpa [#allocation3], 0  ;;  %s142_s0 = inlined_call_operand.hbm [shape: f32[2,1,128], index: 0, kind: input, shape index: {}]   ;;  %s143_s1 = inlined_call_operand.hbm [shape: f32[2,1,128], index: 1, kind: output, shape index: {}]  }
   0x1   :  { %7 = vsyncpa [#allocation4], 0  ;;  %s116_s6 = smov [#allocation2]  }
   0x2   :  { %s13_s7 = sshll.u32 %s116_s6, 4  ;;  %s14_s7 = int_to_ptr.vmem [resolvable:$true] %s13_s7 }
   0x3   :  { %s80_s8 = scalar_lea.vmem %s14_s7, 32  ;;  %p85_p1 = scmp.lt.s32.totalorder %s14_s7, %s14_s7 }
   0x4   :  { %p81_p0 = scmp.ne.s32.totalorder %s14_s7, %s80_s8  ;;  %p86_p2 = scmp.lt.s32.totalorder %s80_s8, %s80_s8 }
   0x6   :  { %p87_p3 = por %p86_p2, %p85_p1 }
   0x8   :  { %p88_p4 = pnand %p87_p3, %p81_p0 }
   0xa   :  { %91 = shalt.err (!%p88_p4)
}
   0xb   :  { %s117_s9 = smov 16   ;;  %s118_s10 = smov 1  }
   0xc   :  { %19 = dma.hbm_to_vmem [thread:$0]  %s142_s0, 32, %s14_s7, [#allocation3], %s117_s9, %s117_s9, %s118_s10  }
   0xd   :  { %112 = dma.done.wait [#allocation3], 32  }
   0xe   :  { %113 = vsyncadd [#allocation3], 4294967264  ;;  %v23_v0 = vld [vmem:[#allocation2] sm:$0x1]  ;;  %v25_v1 = vld [vmem:[#allocation2 + $0x1] sm:$0x1] }
   0xf   :  { %v31_v2 = vld [vmem:[#allocation2 + $0x1] sm:$0x1]  ;;  %v26_v3 = vmax.f32 %v23_v0, %v25_v1  ;;  %s119_s0 = smov [#allocation5]  }
  0x10   :  { %s50_s13 = sshll.u32 %s119_s0, 4  ;;  %s51_s13 = int_to_ptr.vmem [resolvable:$true] %s50_s13 }
  0x11   :  { %v27_v4 = vsub.f32 %v23_v0, %v26_v3  ;;  %v32_v5 = vsub.f32 %v31_v2, %v26_v3  ;;  %s92_s14 = scalar_lea.vmem %s51_s13, 32  ;;  %p97_p6 = scmp.lt.s32.totalorder %s51_s13, %s51_s13 }
  0x12   :  { %p93_p5 = scmp.ne.s32.totalorder %s51_s13, %s92_s14  ;;  %p98_p7 = scmp.lt.s32.totalorder %s92_s14, %s92_s14 }
  0x13   :  { %v28_v6 = vmul.f32 1.442695, %v27_v4  ;;  %v33_v7 = vmul.f32 1.442695, %v32_v5 }
  0x14   :  { %p99_p8 = por %p98_p7, %p97_p6 }
  0x15   :  { %66 = vpow2.f32 %v28_v6 }
  0x16   :  { %68 = vpow2.f32 %v33_v7  ;;  %p100_p9 = pnand %p99_p8, %p93_p5 }
  0x22   :  { %v67_v8 = vpop.eup %66 }
  0x23   :  { %v69_v9 = vpop.eup %68  ;;  %30 = vst [vmem:[#allocation5] sm:$0x1] %v67_v8 }
  0x24   :  { %36 = vst [vmem:[#allocation5 + $0x1] sm:$0x1] %v69_v9  ;;  %v37_v10 = vadd.f32 %v69_v9, %v67_v8 }
  0x26   :  { %70 = vrcp.f32 %v37_v10 }
  0x2a   :  { %v39_v11 = vld [vmem:[#allocation5] sm:$0x1] }
  0x2b   :  { %v42_v12 = vld [vmem:[#allocation5 + $0x1] sm:$0x1] }
  0x33   :  { %v71_v13 = vpop.eup %70 }
  0x34   :  { %v40_v14 = vmul.f32 %v71_v13, %v39_v11  ;;  %v43_v15 = vmul.f32 %v71_v13, %v42_v12 }
  0x36   :  { %41 = vst [vmem:[#allocation5] sm:$0x1] %v40_v14  ;;  %44 = vst [vmem:[#allocation5 + $0x1] sm:$0x1] %v43_v15 }
  0x37   :  { %103 = shalt.err (!%p100_p9)
}
  0x38   :  { %56 = dma.vmem_to_hbm [thread:$0]  %s51_s13, 32, %s143_s1, [#allocation4], %s117_s9, %s117_s9, %s118_s10  }
  0x39   :  { %114 = dma.done.wait [#allocation4], 32  }
  0x3a   :  { %115 = vsyncadd [#allocation4], 4294967264 }
  0x3b   :  { %60 = vsyncpa [#allocation3], 1 }
  0x3c   :  { %61 = vsyncpa [#allocation4], 1 }

</bundles_post_ra>
